<compile_context>
chip_gen: v7x
topology: tpu7x:2x2x1
jax: 0.10.0
libtpu: 0.0.40
codegen_flags: <defaults>
</compile_context>

<pallas_src>
import math

import jax
import jax.numpy as jnp
from jax.experimental import pallas as pl
from jax.experimental.pallas import tpu as pltpu

# ---------------- constants (match module __init__) ----------------
IN_CHANNELS  = 5          # obs = [x, y, vx, vy, yaw] (normalized)
OUT_CHANNELS = 2          # action = [throttle, steering]
HIDDEN       = 32
MAX_SIGMA    = 10.0
MIN_SIGMA    = 0.0001
WHEELBASE    = 2.96
MAX_STEER    = math.radians(80.0)
DT           = 0.1
C_R          = 0.01
C_A          = 0.05
OBS_SCALE    = 10.0       # TODO(synk): obs_scale is never set in the PyTorch __init__; fixed stand-in
NORM_SCALE   = 0.1        # TODO(synk): normalize_state_function is injected in PyTorch; affine stand-in

HALF_PI = float(jnp.pi / 2)

# Weight-slab column layout (32, 72):
#   cols 0:5   W1^T * NORM_SCALE      col 5    b1   (consumed via the ones-row on x)
#   cols 6:38  W2^T                   col 38   b2
#   cols 39:71 W3^T                   col 71   b3
_MLP_COLS  = 72
# Head slab (4, 33): cols 0:32 = [Wmu; Wsigma]^T-rows, col 32 = [bmu; bsigma]
_HEAD_COLS = HIDDEN + 1

_TILE_CAP = 2048   # lanes; (32, 2048) f32 hidden ≈ 256 KiB — spills hide under the EUP bottleneck


def _sigmoid1(z):
    """sigmoid(z) as a single EUP transcendental: 0.5 * (1 + tanh(0.5*z))."""
    return 0.5 * (jnp.tanh(0.5 * z) + 1.0)


# ---------------------------------------------------------------------------
# Kernel: transposed (feature, batch) layout, batch on lanes.
# ---------------------------------------------------------------------------
def gaussian_transition_kernel(x_ref,                 # (6,  Bt)  rows 0..4 = obs, row 5 = ones
                               mlp_ref,               # (32, 72)  packed MLP weights/biases
                               head_ref,              # (4,  33)  packed [mu; sigma] head
                               pred_ref, sigma_ref):  # (5, Bt), (2, Bt)
    xa = x_ref[...].astype(jnp.float32)               # (6, Bt)
    w  = mlp_ref[...]                                 # (32, 72)
    hw = head_ref[...]                                # (4, 33)

    # ---- MLP: 3 x (Linear -> Sigmoid); normalization + b1 folded into cols 0:6 ----
    h = _sigmoid1(jnp.dot(w[:, 0:IN_CHANNELS + 1], xa,
                          preferred_element_type=jnp.float32))
    h = _sigmoid1(jnp.dot(w[:, 6:38], h, preferred_element_type=jnp.float32)
                  + w[:, 38:39])
    h = _sigmoid1(jnp.dot(w[:, 39:71], h, preferred_element_type=jnp.float32)
                  + w[:, 71:72])

    # ---- fused heads: rows 0:2 -> mu, rows 2:4 -> sigma logits ----
    head = jnp.dot(hw[:, 0:HIDDEN], h, preferred_element_type=jnp.float32) \
           + hw[:, HIDDEN:HIDDEN + 1]                                       # (4, Bt)

    sig = _sigmoid1(head[OUT_CHANNELS:, :])                                  # (2, Bt)
    sigma_ref[...] = (MIN_SIGMA + (MAX_SIGMA - MIN_SIGMA) * sig).astype(sigma_ref.dtype)

    throttle = head[0:1, :]                                                  # (1, Bt)
    delta    = jnp.clip(head[1:2, :], -MAX_STEER, MAX_STEER)                 # (1, Bt)

    # ---- kinematic bicycle model on lane-dense rows ----
    x5  = xa[0:IN_CHANNELS, :] * OBS_SCALE                                   # (5, Bt)
    px, py = x5[0:1, :], x5[1:2, :]
    vx, vy = x5[2:3, :], x5[3:4, :]
    yaw    = x5[4:5, :]
    v = jnp.sqrt(vx * vx + vy * vy)

    # batched trig pass 1: one sin over a (4, Bt) tile gives sin/cos of yaw and delta
    ang1 = jnp.concatenate([yaw, yaw + HALF_PI, delta, delta + HALF_PI], axis=0)
    s1 = jnp.sin(ang1)
    sin_yaw, cos_yaw = s1[0:1, :], s1[1:2, :]
    sin_d,   cos_d   = s1[2:3, :], s1[3:4, :]

    f_load = v * (C_R + C_A * v)
    v_new  = v + DT * (throttle - f_load)
    x_new  = px + v_new * cos_yaw * DT
    y_new  = py + v_new * sin_yaw * DT
    yaw_new = yaw + v_new * (sin_d / cos_d) * (DT / WHEELBASE)
    # TODO(synk): KinematicBicycleModel_Pytorch source not provided; angle wrapping
    #             (normalise_angle) omitted — yaw left unwrapped.

    # batched trig pass 2: one sin over a (2, Bt) tile gives sin/cos of yaw_new
    ang2 = jnp.concatenate([yaw_new, yaw_new + HALF_PI], axis=0)
    s2 = jnp.sin(ang2)
    sin_yn, cos_yn = s2[0:1, :], s2[1:2, :]

    inv = 1.0 / OBS_SCALE
    pred_ref[...] = (jnp.concatenate(                 # single lane-dense (5, Bt) store
        [x_new, y_new, v_new * cos_yn, v_new * sin_yn, yaw_new],
        axis=0) * inv).astype(pred_ref.dtype)


# ---------------------------------------------------------------------------
# Tiling policy (generation-aware).
# ---------------------------------------------------------------------------
def _num_tensorcores_per_chip():
    # TODO(synk): no stable public API for TCs/chip; heuristic on device_kind (v7x has 2 TCs).
    try:
        kind = (jax.devices()[0].device_kind or "").lower()
    except Exception:
        return 1
    return 2 if "v7" in kind else 1


def _pick_block_b(Bp, n_tc):
    """Bp is a multiple of 128.  Largest 128-multiple tile dividing Bp, capped at
    _TILE_CAP (amortizes per-grid-step overhead).  On 2-TC chips prefer >=2 grid
    steps when the batch allows, so ("parallel",) shards across both TensorCores."""
    best = 128
    cand = 128
    while cand <= min(Bp, _TILE_CAP):
        if Bp % cand == 0:
            best = cand
        cand *= 2
    if n_tc >= 2 and (Bp // best) < 2 and best >= 256:
        best //= 2
    return best


@jax.jit
def gaussian_transition(x, params):
    """x: (B, IN_CHANNELS) float32.  Returns (pred_state (B,5), sigma (B,OUT_CHANNELS))."""
    B = x.shape[0]
    assert x.shape[1] == IN_CHANNELS
    w1, b1, w2, b2, w3, b3, wmu, bmu, wsig, bsig = params

    # --- wrapper-side weight plumbing: pack everything into 2 resident slabs ---
    mlp_slab = jnp.concatenate([
        w1.T * NORM_SCALE, b1.reshape(HIDDEN, 1),
        w2.T,              b2.reshape(HIDDEN, 1),
        w3.T,              b3.reshape(HIDDEN, 1),
    ], axis=1).astype(jnp.float32)                                        # (32, 72)
    head_slab = jnp.concatenate([
        jnp.concatenate([wmu.T, wsig.T], axis=0),                         # (4, 32)
        jnp.concatenate([bmu.reshape(-1, 1), bsig.reshape(-1, 1)], axis=0),
    ], axis=1).astype(jnp.float32)                                        # (4, 33)

    # --- lane-pad batch to a multiple of 128 so all blocks/stores are lane-dense ---
    Bp = max(128, ((B + 127) // 128) * 128)
    xT = x.T.astype(jnp.float32)                                          # (5, B)
    if Bp != B:
        xT = jnp.pad(xT, ((0, 0), (0, Bp - B)))
    x_aug = jnp.concatenate([xT, jnp.ones((1, Bp), jnp.float32)], axis=0)  # (6, Bp)

    block_b = _pick_block_b(Bp, _num_tensorcores_per_chip())
    grid = (Bp // block_b,)

    full = lambda a: pl.BlockSpec(a.shape, lambda i: (0, 0))   # resident weight slabs
    grid_spec = pltpu.PrefetchScalarGridSpec(
        num_scalar_prefetch=0,
        grid=grid,
        in_specs=[
            pl.BlockSpec((IN_CHANNELS + 1, block_b), lambda i: (0, i)),   # x_aug
            full(mlp_slab),
            full(head_slab),
        ],
        out_specs=[
            pl.BlockSpec((IN_CHANNELS, block_b), lambda i: (0, i)),       # predT
            pl.BlockSpec((OUT_CHANNELS, block_b), lambda i: (0, i)),      # sigmaT
        ],
    )

    # Advisory cost hint so XLA schedules this tiny call sensibly in a larger model.
    n_weights = _MLP_COLS * HIDDEN + _HEAD_COLS * (2 * OUT_CHANNELS)
    cost = pl.CostEstimate(
        flops=2 * Bp * ((IN_CHANNELS + 1) * HIDDEN + 2 * HIDDEN * HIDDEN
                        + HIDDEN * 2 * OUT_CHANNELS) + 60 * Bp,
        transcendentals=Bp * (3 * HIDDEN + OUT_CHANNELS + 8),
        bytes_accessed=4 * (Bp * (IN_CHANNELS + 1) + n_weights
                            + Bp * (IN_CHANNELS + OUT_CHANNELS)),
    )

    predT, sigmaT = pl.pallas_call(
        gaussian_transition_kernel,
        out_shape=(
            jax.ShapeDtypeStruct((IN_CHANNELS, Bp), jnp.float32),
            jax.ShapeDtypeStruct((OUT_CHANNELS, Bp), jnp.float32),
        ),
        grid_spec=grid_spec,
        compiler_params=pltpu.CompilerParams(
            dimension_semantics=("parallel",)),
        cost_estimate=cost,
    )(x_aug, mlp_slab, head_slab)

    return predT[:, :B].T, sigmaT[:, :B].T


def init_params(key):
    """Deterministic init mimicking nn.Linear default (U[-1/sqrt(fan_in), +1/sqrt(fan_in)]).
    Weights stored as (in, out), biases as (1, out); the wrapper packs them for the kernel."""
    def linear(k, fan_in, fan_out):
        kw, kb = jax.random.split(k)
        bound = 1.0 / math.sqrt(fan_in)
        w = jax.random.uniform(kw, (fan_in, fan_out), jnp.float32, -bound, bound)
        b = jax.random.uniform(kb, (1, fan_out), jnp.float32, -bound, bound)
        return w, b

    ks = jax.random.split(key, 5)
    w1, b1   = linear(ks[0], IN_CHANNELS, HIDDEN)
    w2, b2   = linear(ks[1], HIDDEN, HIDDEN)
    w3, b3   = linear(ks[2], HIDDEN, HIDDEN)
    wmu, bmu = linear(ks[3], HIDDEN, OUT_CHANNELS)
    wsg, bsg = linear(ks[4], HIDDEN, OUT_CHANNELS)
    return (w1, b1, w2, b2, w3, b3, wmu, bmu, wsg, bsg)


def reference(x, params):
    """Pure-JAX reference of the same forward pass (for a sanity check)."""
    w1, b1, w2, b2, w3, b3, wmu, bmu, wsig, bsig = params
    nx = x * NORM_SCALE
    h = jax.nn.sigmoid(nx @ w1 + b1)
    h = jax.nn.sigmoid(h @ w2 + b2)
    h = jax.nn.sigmoid(h @ w3 + b3)
    mu = h @ wmu + bmu
    sigma = MIN_SIGMA + (MAX_SIGMA - MIN_SIGMA) * jax.nn.sigmoid(h @ wsig + bsig)

    px, py, vx, vy, yaw = [x[:, i:i + 1] * OBS_SCALE for i in range(5)]
    v = jnp.sqrt(vx * vx + vy * vy)
    thr = mu[:, 0:1]
    dlt = jnp.clip(mu[:, 1:2], -MAX_STEER, MAX_STEER)
    f_load = v * (C_R + C_A * v)
    v_new = v + DT * (thr - f_load)
    x_new = px + v_new * jnp.cos(yaw) * DT
    y_new = py + v_new * jnp.sin(yaw) * DT
    yaw_new = yaw + v_new * jnp.tan(dlt) / WHEELBASE * DT
    pred = jnp.concatenate(
        [x_new, y_new, v_new * jnp.cos(yaw_new), v_new * jnp.sin(yaw_new), yaw_new],
        axis=-1) / OBS_SCALE
    return pred, sigma


if __name__ == "__main__":
    key = jax.random.PRNGKey(0)
    kx, kp = jax.random.split(key)
    params = init_params(kp)

    # B=16: deployment batch (lane-padded to 128, single block).
    # B=384: lane-aligned but non-power-of-2 (grid of 3 x 128 tiles).
    # B=2048: large-batch path exercising the 2048-lane tile cap / 2-step v7x grid.
    for B in (16, 384, 2048):
        x = jax.random.normal(jax.random.fold_in(kx, B), (B, IN_CHANNELS), jnp.float32)

        pred, sigma = gaussian_transition(x, params)
        jax.block_until_ready((pred, sigma))

        pred_ref, sigma_ref = reference(x, params)
        assert pred.shape == (B, IN_CHANNELS) and sigma.shape == (B, OUT_CHANNELS)
        assert jnp.allclose(pred, pred_ref, atol=1e-4, rtol=1e-4), f"pred mismatch at B={B}"
        assert jnp.allclose(sigma, sigma_ref, atol=1e-4, rtol=1e-4), f"sigma mismatch at B={B}"

    print("KERNEL_OK")
</pallas_src>

<mosaic_0001>
module attributes {stable_mosaic.version = 11 : i64} {
  func.func @gaussian_transition_kernel(%arg0: i32, %arg1: memref<6x128xf32, #tpu.memory_space<vmem>>, %arg2: memref<32x72xf32, #tpu.memory_space<vmem>>, %arg3: memref<4x33xf32, #tpu.memory_space<vmem>>, %arg4: memref<5x128xf32, #tpu.memory_space<vmem>>, %arg5: memref<2x128xf32, #tpu.memory_space<vmem>>) attributes {dimension_semantics = [#tpu.dimension_semantics<parallel>], iteration_bounds = array<i64: 1>, scalar_prefetch = 0 : i64, scratch_operands = 0 : i64, tpu.core_type = #tpu.core_type<tc>, window_params = [{transform_indices = @transform_0, window_bounds = array<i64: 6, 128>}, {pipeline_mode = #tpu.pipeline_mode<synchronous>, transform_indices = @transform_1, window_bounds = array<i64: 32, 72>}, {pipeline_mode = #tpu.pipeline_mode<synchronous>, transform_indices = @transform_2, window_bounds = array<i64: 4, 33>}, {transform_indices = @transform_3, window_bounds = array<i64: 5, 128>}, {transform_indices = @transform_4, window_bounds = array<i64: 2, 128>}]} {
    %c0 = arith.constant 0 : index
    %c0_0 = arith.constant 0 : index
    %0 = vector.load %arg1[%c0, %c0_0] : memref<6x128xf32, #tpu.memory_space<vmem>>, vector<6x128xf32>
    %c0_1 = arith.constant 0 : index
    %c0_2 = arith.constant 0 : index
    %1 = vector.load %arg2[%c0_1, %c0_2] : memref<32x72xf32, #tpu.memory_space<vmem>>, vector<32x72xf32>
    %c0_3 = arith.constant 0 : index
    %c0_4 = arith.constant 0 : index
    %2 = vector.load %arg3[%c0_3, %c0_4] : memref<4x33xf32, #tpu.memory_space<vmem>>, vector<4x33xf32>
    %3 = vector.extract_strided_slice %1 {offsets = [0, 0], sizes = [32, 6], strides = [1, 1]} : vector<32x72xf32> to vector<32x6xf32>
    %cst = arith.constant dense<0.000000e+00> : vector<32x128xf32>
    %4 = tpu.matmul %3, %0, %cst {dimension_numbers = #tpu.dot_dimension_numbers<[1], [0], [0], [1], [0, 0, 1, 1], [], []>} : vector<32x6xf32>, vector<6x128xf32>, vector<32x128xf32> -> vector<32x128xf32>
    %cst_5 = arith.constant 5.000000e-01 : f32
    %5 = vector.broadcast %cst_5 : f32 to vector<32x128xf32>
    %6 = arith.mulf %5, %4 : vector<32x128xf32>
    %7 = math.tanh %6 : vector<32x128xf32>
    %cst_6 = arith.constant 1.000000e+00 : f32
    %8 = vector.broadcast %cst_6 : f32 to vector<32x128xf32>
    %9 = arith.addf %7, %8 : vector<32x128xf32>
    %cst_7 = arith.constant 5.000000e-01 : f32
    %10 = vector.broadcast %cst_7 : f32 to vector<32x128xf32>
    %11 = arith.mulf %10, %9 : vector<32x128xf32>
    %12 = vector.extract_strided_slice %1 {offsets = [0, 6], sizes = [32, 32], strides = [1, 1]} : vector<32x72xf32> to vector<32x32xf32>
    %cst_8 = arith.constant dense<0.000000e+00> : vector<32x128xf32>
    %13 = tpu.matmul %12, %11, %cst_8 {dimension_numbers = #tpu.dot_dimension_numbers<[1], [0], [0], [1], [0, 0, 1, 1], [], []>} : vector<32x32xf32>, vector<32x128xf32>, vector<32x128xf32> -> vector<32x128xf32>
    %14 = vector.extract_strided_slice %1 {offsets = [0, 38], sizes = [32, 1], strides = [1, 1]} : vector<32x72xf32> to vector<32x1xf32>
    %15 = vector.broadcast %14 : vector<32x1xf32> to vector<32x128xf32>
    %16 = arith.addf %13, %15 : vector<32x128xf32>
    %cst_9 = arith.constant 5.000000e-01 : f32
    %17 = vector.broadcast %cst_9 : f32 to vector<32x128xf32>
    %18 = arith.mulf %17, %16 : vector<32x128xf32>
    %19 = math.tanh %18 : vector<32x128xf32>
    %cst_10 = arith.constant 1.000000e+00 : f32
    %20 = vector.broadcast %cst_10 : f32 to vector<32x128xf32>
    %21 = arith.addf %19, %20 : vector<32x128xf32>
    %cst_11 = arith.constant 5.000000e-01 : f32
    %22 = vector.broadcast %cst_11 : f32 to vector<32x128xf32>
    %23 = arith.mulf %22, %21 : vector<32x128xf32>
    %24 = vector.extract_strided_slice %1 {offsets = [0, 39], sizes = [32, 32], strides = [1, 1]} : vector<32x72xf32> to vector<32x32xf32>
    %cst_12 = arith.constant dense<0.000000e+00> : vector<32x128xf32>
    %25 = tpu.matmul %24, %23, %cst_12 {dimension_numbers = #tpu.dot_dimension_numbers<[1], [0], [0], [1], [0, 0, 1, 1], [], []>} : vector<32x32xf32>, vector<32x128xf32>, vector<32x128xf32> -> vector<32x128xf32>
    %26 = vector.extract_strided_slice %1 {offsets = [0, 71], sizes = [32, 1], strides = [1, 1]} : vector<32x72xf32> to vector<32x1xf32>
    %27 = vector.broadcast %26 : vector<32x1xf32> to vector<32x128xf32>
    %28 = arith.addf %25, %27 : vector<32x128xf32>
    %cst_13 = arith.constant 5.000000e-01 : f32
    %29 = vector.broadcast %cst_13 : f32 to vector<32x128xf32>
    %30 = arith.mulf %29, %28 : vector<32x128xf32>
    %31 = math.tanh %30 : vector<32x128xf32>
    %cst_14 = arith.constant 1.000000e+00 : f32
    %32 = vector.broadcast %cst_14 : f32 to vector<32x128xf32>
    %33 = arith.addf %31, %32 : vector<32x128xf32>
    %cst_15 = arith.constant 5.000000e-01 : f32
    %34 = vector.broadcast %cst_15 : f32 to vector<32x128xf32>
    %35 = arith.mulf %34, %33 : vector<32x128xf32>
    %36 = vector.extract_strided_slice %2 {offsets = [0, 0], sizes = [4, 32], strides = [1, 1]} : vector<4x33xf32> to vector<4x32xf32>
    %cst_16 = arith.constant dense<0.000000e+00> : vector<4x128xf32>
    %37 = tpu.matmul %36, %35, %cst_16 {dimension_numbers = #tpu.dot_dimension_numbers<[1], [0], [0], [1], [0, 0, 1, 1], [], []>} : vector<4x32xf32>, vector<32x128xf32>, vector<4x128xf32> -> vector<4x128xf32>
    %38 = vector.extract_strided_slice %2 {offsets = [0, 32], sizes = [4, 1], strides = [1, 1]} : vector<4x33xf32> to vector<4x1xf32>
    %39 = vector.broadcast %38 : vector<4x1xf32> to vector<4x128xf32>
    %40 = arith.addf %37, %39 : vector<4x128xf32>
    %41 = vector.extract_strided_slice %40 {offsets = [2, 0], sizes = [2, 128], strides = [1, 1]} : vector<4x128xf32> to vector<2x128xf32>
    %cst_17 = arith.constant 5.000000e-01 : f32
    %42 = vector.broadcast %cst_17 : f32 to vector<2x128xf32>
    %43 = arith.mulf %42, %41 : vector<2x128xf32>
    %44 = math.tanh %43 : vector<2x128xf32>
    %cst_18 = arith.constant 1.000000e+00 : f32
    %45 = vector.broadcast %cst_18 : f32 to vector<2x128xf32>
    %46 = arith.addf %44, %45 : vector<2x128xf32>
    %cst_19 = arith.constant 5.000000e-01 : f32
    %47 = vector.broadcast %cst_19 : f32 to vector<2x128xf32>
    %48 = arith.mulf %47, %46 : vector<2x128xf32>
    %cst_20 = arith.constant 9.99989986 : f32
    %49 = vector.broadcast %cst_20 : f32 to vector<2x128xf32>
    %50 = arith.mulf %49, %48 : vector<2x128xf32>
    %cst_21 = arith.constant 9.99999974E-5 : f32
    %51 = vector.broadcast %cst_21 : f32 to vector<2x128xf32>
    %52 = arith.addf %51, %50 : vector<2x128xf32>
    %c0_22 = arith.constant 0 : index
    %c0_23 = arith.constant 0 : index
    %53 = vector.load %arg5[%c0_22, %c0_23] : memref<2x128xf32, #tpu.memory_space<vmem>>, vector<2x128xf32>
    tpu.vector_store %arg5[%c0_22, %c0_23], %52 {strides = array<i32>} : memref<2x128xf32, #tpu.memory_space<vmem>>, vector<2x128xf32>,
    %54 = vector.extract_strided_slice %40 {offsets = [0, 0], sizes = [1, 128], strides = [1, 1]} : vector<4x128xf32> to vector<1x128xf32>
    %55 = vector.extract_strided_slice %40 {offsets = [1, 0], sizes = [1, 128], strides = [1, 1]} : vector<4x128xf32> to vector<1x128xf32>
    %cst_24 = arith.constant -1.39626336 : f32
    %cst_25 = arith.constant 1.39626336 : f32
    %56 = vector.broadcast %cst_24 : f32 to vector<1x128xf32>
    %57 = arith.maximumf %56, %55 : vector<1x128xf32>
    %58 = vector.broadcast %cst_25 : f32 to vector<1x128xf32>
    %59 = arith.minimumf %58, %57 : vector<1x128xf32>
    %60 = vector.extract_strided_slice %0 {offsets = [0, 0], sizes = [5, 128], strides = [1, 1]} : vector<6x128xf32> to vector<5x128xf32>
    %cst_26 = arith.constant 1.000000e+01 : f32
    %61 = vector.broadcast %cst_26 : f32 to vector<5x128xf32>
    %62 = arith.mulf %60, %61 : vector<5x128xf32>
    %63 = vector.extract_strided_slice %62 {offsets = [0, 0], sizes = [1, 128], strides = [1, 1]} : vector<5x128xf32> to vector<1x128xf32>
    %64 = vector.extract_strided_slice %62 {offsets = [1, 0], sizes = [1, 128], strides = [1, 1]} : vector<5x128xf32> to vector<1x128xf32>
    %65 = vector.extract_strided_slice %62 {offsets = [2, 0], sizes = [1, 128], strides = [1, 1]} : vector<5x128xf32> to vector<1x128xf32>
    %66 = vector.extract_strided_slice %62 {offsets = [3, 0], sizes = [1, 128], strides = [1, 1]} : vector<5x128xf32> to vector<1x128xf32>
    %67 = vector.extract_strided_slice %62 {offsets = [4, 0], sizes = [1, 128], strides = [1, 1]} : vector<5x128xf32> to vector<1x128xf32>
    %68 = arith.mulf %65, %65 : vector<1x128xf32>
    %69 = arith.mulf %66, %66 : vector<1x128xf32>
    %70 = arith.addf %68, %69 : vector<1x128xf32>
    %71 = math.sqrt %70 : vector<1x128xf32>
    %cst_27 = arith.constant 1.57079637 : f32
    %72 = vector.broadcast %cst_27 : f32 to vector<1x128xf32>
    %73 = arith.addf %67, %72 : vector<1x128xf32>
    %cst_28 = arith.constant 1.57079637 : f32
    %74 = vector.broadcast %cst_28 : f32 to vector<1x128xf32>
    %75 = arith.addf %59, %74 : vector<1x128xf32>
    %76 = tpu.concatenate %67, %73, %59, %75 in 0 : vector<1x128xf32>, vector<1x128xf32>, vector<1x128xf32>, vector<1x128xf32> -> vector<4x128xf32>
    %77 = math.sin %76 : vector<4x128xf32>
    %78 = vector.extract_strided_slice %77 {offsets = [0, 0], sizes = [1, 128], strides = [1, 1]} : vector<4x128xf32> to vector<1x128xf32>
    %79 = vector.extract_strided_slice %77 {offsets = [1, 0], sizes = [1, 128], strides = [1, 1]} : vector<4x128xf32> to vector<1x128xf32>
    %80 = vector.extract_strided_slice %77 {offsets = [2, 0], sizes = [1, 128], strides = [1, 1]} : vector<4x128xf32> to vector<1x128xf32>
    %81 = vector.extract_strided_slice %77 {offsets = [3, 0], sizes = [1, 128], strides = [1, 1]} : vector<4x128xf32> to vector<1x128xf32>
    %cst_29 = arith.constant 5.000000e-02 : f32
    %82 = vector.broadcast %cst_29 : f32 to vector<1x128xf32>
    %83 = arith.mulf %82, %71 : vector<1x128xf32>
    %cst_30 = arith.constant 0.00999999977 : f32
    %84 = vector.broadcast %cst_30 : f32 to vector<1x128xf32>
    %85 = arith.addf %84, %83 : vector<1x128xf32>
    %86 = arith.mulf %71, %85 : vector<1x128xf32>
    %87 = arith.subf %54, %86 : vector<1x128xf32>
    %cst_31 = arith.constant 1.000000e-01 : f32
    %88 = vector.broadcast %cst_31 : f32 to vector<1x128xf32>
    %89 = arith.mulf %88, %87 : vector<1x128xf32>
    %90 = arith.addf %71, %89 : vector<1x128xf32>
    %91 = arith.mulf %90, %79 : vector<1x128xf32>
    %cst_32 = arith.constant 1.000000e-01 : f32
    %92 = vector.broadcast %cst_32 : f32 to vector<1x128xf32>
    %93 = arith.mulf %91, %92 : vector<1x128xf32>
    %94 = arith.addf %63, %93 : vector<1x128xf32>
    %95 = arith.mulf %90, %78 : vector<1x128xf32>
    %cst_33 = arith.constant 1.000000e-01 : f32
    %96 = vector.broadcast %cst_33 : f32 to vector<1x128xf32>
    %97 = arith.mulf %95, %96 : vector<1x128xf32>
    %98 = arith.addf %64, %97 : vector<1x128xf32>
    %99 = arith.divf %80, %81 : vector<1x128xf32>
    %100 = arith.mulf %90, %99 : vector<1x128xf32>
    %cst_34 = arith.constant 0.0337837823 : f32
    %101 = vector.broadcast %cst_34 : f32 to vector<1x128xf32>
    %102 = arith.mulf %100, %101 : vector<1x128xf32>
    %103 = arith.addf %67, %102 : vector<1x128xf32>
    %cst_35 = arith.constant 1.57079637 : f32
    %104 = vector.broadcast %cst_35 : f32 to vector<1x128xf32>
    %105 = arith.addf %103, %104 : vector<1x128xf32>
    %106 = tpu.concatenate %103, %105 in 0 : vector<1x128xf32>, vector<1x128xf32> -> vector<2x128xf32>
    %107 = math.sin %106 : vector<2x128xf32>
    %108 = vector.extract_strided_slice %107 {offsets = [0, 0], sizes = [1, 128], strides = [1, 1]} : vector<2x128xf32> to vector<1x128xf32>
    %109 = vector.extract_strided_slice %107 {offsets = [1, 0], sizes = [1, 128], strides = [1, 1]} : vector<2x128xf32> to vector<1x128xf32>
    %110 = arith.mulf %90, %109 : vector<1x128xf32>
    %111 = arith.mulf %90, %108 : vector<1x128xf32>
    %112 = tpu.concatenate %94, %98, %110, %111, %103 in 0 : vector<1x128xf32>, vector<1x128xf32>, vector<1x128xf32>, vector<1x128xf32>, vector<1x128xf32> -> vector<5x128xf32>
    %cst_36 = arith.constant 1.000000e-01 : f32
    %113 = vector.broadcast %cst_36 : f32 to vector<5x128xf32>
    %114 = arith.mulf %112, %113 : vector<5x128xf32>
    %c0_37 = arith.constant 0 : index
    %c0_38 = arith.constant 0 : index
    %115 = vector.load %arg4[%c0_37, %c0_38] : memref<5x128xf32, #tpu.memory_space<vmem>>, vector<5x128xf32>
    tpu.vector_store %arg4[%c0_37, %c0_38], %114 {strides = array<i32>} : memref<5x128xf32, #tpu.memory_space<vmem>>, vector<5x128xf32>,
    return
  }
  func.func @transform_0(%arg0: i32) -> (i32, i32) {
    %c0_i32 = arith.constant 0 : i32
    %c0_i32_0 = arith.constant 0 : i32
    return %c0_i32, %arg0 : i32, i32
  }
  func.func @transform_1(%arg0: i32) -> (i32, i32) {
    %c0_i32 = arith.constant 0 : i32
    %c0_i32_0 = arith.constant 0 : i32
    %c0_i32_1 = arith.constant 0 : i32
    return %c0_i32, %c0_i32_0 : i32, i32
  }
  func.func @transform_2(%arg0: i32) -> (i32, i32) {
    %c0_i32 = arith.constant 0 : i32
    %c0_i32_0 = arith.constant 0 : i32
    %c0_i32_1 = arith.constant 0 : i32
    return %c0_i32, %c0_i32_0 : i32, i32
  }
  func.func @transform_3(%arg0: i32) -> (i32, i32) {
    %c0_i32 = arith.constant 0 : i32
    %c0_i32_0 = arith.constant 0 : i32
    return %c0_i32, %arg0 : i32, i32
  }
  func.func @transform_4(%arg0: i32) -> (i32, i32) {
    %c0_i32 = arith.constant 0 : i32
    %c0_i32_0 = arith.constant 0 : i32
    return %c0_i32, %arg0 : i32, i32
  }
}

</mosaic_0001>

<bundles_post_ra>
// kernel: gaussian_transition.1
= control target key start
LH: loop header
LB: loop body
LE: loop exit
PB: predicated region body
PF: predicated region fallthrough
CT: control target
= control target key end

     0   :  { %vm35_vm0 = vcmask 1045504   ;;  %vm22_vm1 = vcmask 48128   ;;  %vm164_vm2 = vcmask 261120   ;;  %v990_v6 = vmov 38   ;;  %s1197_s0 = inlined_call_operand.vmem [shape: f32[6,128], index: 0, kind: input, shape index: {}]   ;;  %s1198_s1 = inlined_call_operand.vmem [shape: f32[32,72], index: 1, kind: input, shape index: {}]   ;;  %s1199_s2 = inlined_call_operand.vmem [shape: f32[4,33], index: 2, kind: input, shape index: {}]   ;;  %s1200_s4 = inlined_call_operand.vmem [shape: f32[2,128], index: 4, kind: output, shape index: {1}]   ;;  %s1201_s3 = inlined_call_operand.vmem [shape: f32[5,128], index: 3, kind: output, shape index: {0}]  }
   0x1   :  { %v1031_v0 = vld [vmem:[%s1197_s0] sm:$0x3f]  ;;  %v1041_v2 = vld [vmem:[%s1198_s1 + $0x8] sm:$0xff]  ;;  %v1048_v3 = vld [vmem:[%s1198_s1 + $0x10] sm:$0xff]  ;;  %s989_s0 = smov 122   ;;  %947 = vset.pattern.permute.xlu1 %v990_v6  ;;  %946 = vset.pattern.permute.xlu0 %v990_v6  ;;  %v992_v35 = vmov 71  }
   0x2   :  { %v1036_v1 = vld [vmem:[%s1198_s1] sm:$0xff]  ;;  %855 = vmatprep.subr.msk.mxu0 %vm35_vm0, %v1031_v0  ;;  %160 = vrot.lane.b32.xlu1 %v1048_v3, %s989_s0  ;;  %v1058_v4 = vld [vmem:[%s1198_s1 + $0x18] sm:$0xff]  ;;  %s991_s1 = smov 89   ;;  %vm994_vm3 = vmmov 0   ;;  %vm520_vm4 = vcmask 1040384   ;;  %vm522_vm5 = vcmask 1041408  }
   0x3   :  { %857 = vmatprep.mubr.msk.f32.mxu0 %vm22_vm1, %v1036_v1  ;;  %856 = vmatpush3.msk.msra.mxu0 %vm35_vm0, %v1031_v0  ;;  %v21_v6 = vld [vmem:[%s1199_s2] sm:$0xf]  ;;  %vm524_vm6 = vcmask 1042432  }
   0x4   :  { %156 = vrot.lane.b32.xlu0 %v1036_v1, %s989_s0  ;;  %858 = vmatmul.mubr.msk.f32.vlgmr.msra.gmra.mrb[0].mxu0 %vm22_vm1, %v1041_v2 }
   0x5   :  { %860 = vmatprep.mubr.msk.f32.mxu0 %vm22_vm1, %v1048_v3 }
   0x6   :  { %162 = vrot.lane.b32.xlu1 %v1058_v4, %s989_s0 }
   0x8   :  { %158 = vrot.lane.b32.xlu0 %v1041_v2, %s989_s0  ;;  %861 = vmatmul.mubr.msk.f32.gmra.mrb[2].mxu0 %vm22_vm1, %v1058_v4 }
   0xa   :  { %145 = vperm.xlu1 %947, %v1041_v2  }
   0xc   :  { %141 = vperm.xlu0 %946, %v1036_v1  }
   0xe   :  { %149 = vperm.xlu1 %947, %v1048_v3  }
  0x10   :  { %153 = vperm.xlu0 %946, %v1058_v4  }
  0x12   :  { %290 = vrot.lane.b32.xlu1 %v1036_v1, %s991_s1 }
  0x13   :  { %948 = vset.pattern.permute.xlu1 %v992_v35 }
  0x14   :  { %292 = vrot.lane.b32.xlu0 %v1041_v2, %s991_s1 }
  0x15   :  { %949 = vset.pattern.permute.xlu0 %v992_v35 }
  0x16   :  { %294 = vrot.lane.b32.xlu1 %v1048_v3, %s991_s1 }
  0x18   :  { %296 = vrot.lane.b32.xlu0 %v1058_v4, %s991_s1 }
  0x1a   :  { %275 = vperm.xlu1 %948, %v1036_v1  }
  0x1c   :  { %279 = vperm.xlu0 %949, %v1041_v2  }
  0x1e   :  { %283 = vperm.xlu1 %948, %v1048_v3  }
  0x22   :  { %287 = vperm.xlu1 %948, %v1058_v4   ;;  %v993_v4 = vmov 0.0|0.0  }
  0x74   :  { %v161_v29 = vpop.permute.xlu1 %160 }
  0x76   :  { %v157_v5 = vpop.permute.xlu0 %156 }
  0x77   :  { %871 = vmatprep.mubr.msk.f32.mxu1 %vm164_vm2, %v157_v5  ;;  %v995_v5 = vmov 0.0  }
  0x78   :  { %v163_v31 = vpop.permute.xlu1 %162 }
  0x7a   :  { %v159_v30 = vpop.permute.xlu0 %158 }
  0x89   :  { %v146_v32 = vpop.permute.xlu1 %145 }
  0x8b   :  { %v142_v36 = vpop.permute.xlu0 %141 }
  0x8d   :  { %v150_v33 = vpop.permute.xlu1 %149 }
  0x8f   :  { %v154_v42 = vpop.permute.xlu0 %153 }
  0x91   :  { %v291_v34 = vpop.permute.xlu1 %290 }
  0x92   :  { %885 = vmatprep.mubr.msk.f32.mxu0 %vm164_vm2, %v291_v34 }
  0x93   :  { %v293_v1 = vpop.permute.xlu0 %292 }
  0x95   :  { %v295_v2 = vpop.permute.xlu1 %294 }
  0x97   :  { %v297_v3 = vpop.permute.xlu0 %296 }
  0xd7   :  { %v859_v7 = vpop.f32.mrb[0].mxu0 }
  0xd8   :  { %v125_v8 = vmul.f32 0.5, %v859_v7  ;;  %v105_v9 = vpop.f32.mrb[1].mxu0  ;;  %v996_v7 = vmov 32  }
  0xd9   :  { %v124_v10 = vmul.f32 0.5, %v105_v9  ;;  %950 = vset.pattern.permute.xlu0 %v996_v7  ;;  %v998_v7 = vmov 2475754826  }
  0xda   :  { %951 = vtanh.f32 %v125_v8  ;;  %409 = vperm.xlu0 %950, %v21_v6   ;;  %v276_v8 = vpop.permute.xlu1 %275 }
  0xdb   :  { %953 = vtanh.f32 %v124_v10  ;;  %v862_v11 = vpop.f32.mrb[2].mxu0  ;;  %v280_v10 = vpop.permute.xlu0 %279 }
  0xdc   :  { %v127_v12 = vmul.f32 0.5, %v862_v11  ;;  %v115_v13 = vpop.f32.mrb[3].mxu0 }
  0xdd   :  { %v126_v14 = vmul.f32 0.5, %v115_v13 }
  0xde   :  { %955 = vtanh.f32 %v127_v12  ;;  %v284_v9 = vpop.permute.xlu1 %283 }
  0xdf   :  { %957 = vtanh.f32 %v126_v14 }
  0xe4   :  { %v952_v15 = vpop.eup %951 }
  0xe5   :  { %v954_v16 = vpop.eup %953  ;;  %v133_v17 = vadd.f32 1.0, %v952_v15 }
  0xe6   :  { %v132_v18 = vadd.f32 1.0, %v954_v16  ;;  %v288_v16 = vpop.permute.xlu1 %287 }
  0xe7   :  { %v137_v19 = vmul.f32 0.5, %v133_v17 }
  0xe8   :  { %v956_v20 = vpop.eup %955  ;;  %v136_v21 = vmul.f32 0.5, %v132_v18 }
  0xe9   :  { %v958_v22 = vpop.eup %957  ;;  %v135_v23 = vadd.f32 1.0, %v956_v20 }
  0xea   :  { %v134_v24 = vadd.f32 1.0, %v958_v22  ;;  %v902_v25 = vpack.c.bf16 %v137_v19, %v136_v21 }
  0xeb   :  { %v139_v26 = vmul.f32 0.5, %v135_v23 }
  0xec   :  { %v138_v27 = vmul.f32 0.5, %v134_v24  ;;  %903 = vmatprep.subr.bf16.mxu1 %v902_v25 }
  0xed   :  { %905 = vmatpush3.bf16.msra.mxu1 %v902_v25 }
  0xee   :  { %v906_v28 = vpack.c.bf16 %v139_v26, %v138_v27 }
  0xf0   :  { %907 = vmatprep.subr.bf16.mxu1 %v906_v28 }
  0xf1   :  { %909 = vmatpush3.bf16.msra.mxu1 %v906_v28 }
  0xf2   :  { %918 = vmatprep.subr.bf16.mxu1 %v993_v4 }
  0xf4   :  { %872 = vmatmul.mubr.msk.f32.vlgmr.msra.gmra.mrb[0].mxu1 %vm164_vm2, %v159_v30 }
  0xf5   :  { %874 = vmatprep.mubr.msk.f32.mxu1 %vm164_vm2, %v161_v29 }
  0xf8   :  { %875 = vmatmul.mubr.msk.f32.gmra.mrb[2].mxu1 %vm164_vm2, %v163_v31 }
  0xf9   :  { %899 = vmatprep.mubr.msk.f32.mxu1 %vm994_vm3, %v995_v5  ;;  %v997_v5 = vmov 683565275  }
 0x1c7   :  { %v873_v37 = vpop.f32.mrb[0].mxu1 }
 0x1c8   :  { %v245_v38 = vadd.f32 %v873_v37, %v146_v32  ;;  %v239_v39 = vpop.f32.mrb[1].mxu1 }
 0x1c9   :  { %v240_v40 = vadd.f32 %v239_v39, %v142_v36 }
 0x1ca   :  { %v259_v41 = vmul.f32 0.5, %v245_v38  ;;  %v1088_v38 = vmul.f32 10.0, %v1031_v0 }
 0x1cb   :  { %v258_v43 = vmul.f32 0.5, %v240_v40  ;;  %v876_v44 = vpop.f32.mrb[2].mxu1  ;;  %v410_v40 = vpop.permute.xlu0 %409 }
 0x1cc   :  { %959 = vtanh.f32 %v259_v41  ;;  %v255_v45 = vadd.f32 %v876_v44, %v154_v42  ;;  %v249_v46 = vpop.f32.mrb[3].mxu1  ;;  %v506_v39 = vadd.f32 1.5707964, %v1088_v38  ;;  %v509_v42 = vrot.slane %v1088_v38, 4 }
 0x1cd   :  { %961 = vtanh.f32 %v258_v43  ;;  %v250_v47 = vadd.f32 %v249_v46, %v150_v33 }
 0x1ce   :  { %v261_v48 = vmul.f32 0.5, %v255_v45  ;;  %v512_v43 = vrot.slane %v506_v39, 3 }
 0x1cf   :  { %v260_v49 = vmul.f32 0.5, %v250_v47 }
 0x1d0   :  { %963 = vtanh.f32 %v261_v48  ;;  %v521_v48 = vsel %vm520_vm4, %v509_v42, %v512_v43 }
 0x1d1   :  { %965 = vtanh.f32 %v260_v49 }
 0x1d6   :  { %v960_v50 = vpop.eup %959 }
 0x1d7   :  { %v962_v51 = vpop.eup %961  ;;  %v267_v52 = vadd.f32 1.0, %v960_v50 }
 0x1d8   :  { %v266_v53 = vadd.f32 1.0, %v962_v51 }
 0x1d9   :  { %v271_v54 = vmul.f32 0.5, %v267_v52 }
 0x1da   :  { %v964_v55 = vpop.eup %963  ;;  %v270_v56 = vmul.f32 0.5, %v266_v53 }
 0x1db   :  { %v966_v57 = vpop.eup %965  ;;  %v269_v58 = vadd.f32 1.0, %v964_v55 }
 0x1dc   :  { %v268_v59 = vadd.f32 1.0, %v966_v57  ;;  %v910_v60 = vpack.c.bf16 %v271_v54, %v270_v56 }
 0x1dd   :  { %v273_v61 = vmul.f32 0.5, %v269_v58 }
 0x1de   :  { %v272_v62 = vmul.f32 0.5, %v268_v59  ;;  %911 = vmatprep.subr.bf16.mxu0 %v910_v60 }
 0x1df   :  { %913 = vmatpush3.bf16.msra.mxu0 %v910_v60 }
 0x1e0   :  { %v914_v63 = vpack.c.bf16 %v273_v61, %v272_v62 }
 0x1e2   :  { %915 = vmatprep.subr.bf16.mxu0 %v914_v63 }
 0x1e3   :  { %917 = vmatpush3.bf16.msra.mxu0 %v914_v63 }
 0x1e6   :  { %886 = vmatmul.mubr.msk.f32.vlgmr.msra.gmra.mrb[4].mxu0 %vm164_vm2, %v293_v1 }
 0x1e7   :  { %888 = vmatprep.mubr.msk.f32.mxu0 %vm164_vm2, %v295_v2 }
 0x1ea   :  { %889 = vmatmul.mubr.msk.f32.gmra.mrb[6].mxu0 %vm164_vm2, %v297_v3 }
 0x2b9   :  { %v887_v11 = vpop.f32.mrb[4].mxu0 }
 0x2ba   :  { %v378_v12 = vadd.f32 %v887_v11, %v280_v10  ;;  %v372_v13 = vpop.f32.mrb[5].mxu0  ;;  %v999_v10 = vmov 2131351028  }
 0x2bb   :  { %v373_v14 = vadd.f32 %v372_v13, %v276_v8  ;;  %v1000_v13 = vmov 2102212464  }
 0x2bc   :  { %v392_v15 = vmul.f32 0.5, %v378_v12 }
 0x2bd   :  { %v391_v17 = vmul.f32 0.5, %v373_v14  ;;  %v890_v18 = vpop.f32.mrb[6].mxu0 }
 0x2be   :  { %967 = vtanh.f32 %v392_v15  ;;  %v388_v19 = vadd.f32 %v890_v18, %v288_v16  ;;  %v382_v20 = vpop.f32.mrb[7].mxu0  ;;  %v1001_v16 = vmov 920167782  }
 0x2bf   :  { %969 = vtanh.f32 %v391_v17  ;;  %v383_v21 = vadd.f32 %v382_v20, %v284_v9 }
 0x2c0   :  { %v394_v22 = vmul.f32 0.5, %v388_v19  ;;  %v1002_v19 = vmov 1326507024  }
 0x2c1   :  { %v393_v23 = vmul.f32 0.5, %v383_v21 }
 0x2c2   :  { %971 = vtanh.f32 %v394_v22 }
 0x2c3   :  { %973 = vtanh.f32 %v393_v23 }
 0x2c8   :  { %v968_v24 = vpop.eup %967 }
 0x2c9   :  { %v970_v25 = vpop.eup %969  ;;  %v400_v26 = vadd.f32 1.0, %v968_v24 }
 0x2ca   :  { %v399_v27 = vadd.f32 1.0, %v970_v25 }
 0x2cb   :  { %v404_v28 = vmul.f32 0.5, %v400_v26 }
 0x2cc   :  { %v972_v29 = vpop.eup %971  ;;  %v403_v30 = vmul.f32 0.5, %v399_v27 }
 0x2cd   :  { %v974_v31 = vpop.eup %973  ;;  %v402_v32 = vadd.f32 1.0, %v972_v29 }
 0x2ce   :  { %v919_v33 = vpack.c.bf16 %v404_v28, %v403_v30  ;;  %v401_v34 = vadd.f32 1.0, %v974_v31 }
 0x2cf   :  { %v406_v35 = vmul.f32 0.5, %v402_v32 }
 0x2d0   :  { %v405_v36 = vmul.f32 0.5, %v401_v34  ;;  %920 = vmatpush3.bf16.msra.mxu1 %v919_v33 }
 0x2d1   :  { %921 = vmatprep.subr.bf16.mxu1 %v993_v4 }
 0x2d2   :  { %v922_v37 = vpack.c.bf16 %v406_v35, %v405_v36 }
 0x2d4   :  { %923 = vmatpush3.bf16.msra.mxu1 %v922_v37 }
 0x2d7   :  { %900 = vmatmul.mubr.msk.f32.vlgmr.msra.gmra.mrb[4].mxu1 %vm164_vm2, %v21_v6 }
 0x3aa   :  { %v480_v41 = vpop.f32.mrb[4].mxu1 }
 0x3ab   :  { %v1092_v44 = vadd.f32 %v480_v41, %v410_v40  ;;  %v901_v45 = vpop.f32.mrb[5].mxu1 }
 0x3ad   :  { %v484_v46 = vmul.f32 0.5, %v1092_v44  ;;  %v820_v47 = vclamps-f32 %v1092_v44, 1.3962634 }
 0x3af   :  { %975 = vtanh.f32 %v484_v46  ;;  %v507_v0 = vadd.f32 1.5707964, %v820_v47  ;;  %v515_v49 = vrot.slane %v820_v47, 7 }
 0x3b1   :  { %v518_v50 = vrot.slane %v507_v0, 6  ;;  %v523_v51 = vsel %vm522_vm5, %v521_v48, %v515_v49 }
 0x3b3   :  { %v1099_v52 = vsel %vm524_vm6, %v523_v51, %v518_v50  ;;  %v494_v51 = vmul.f32 %v1088_v38, %v1088_v38 }
 0x3b4   :  { %v529_v53 = vand.u32 2139095040, %v1099_v52  ;;  %v526_v60 = vand.u32 2147483647, %v1099_v52  ;;  %vm528_vm0 = vcmp.lt.s32.totalorder %v1099_v52, 0 }
 0x3b6   :  { %v530_v54 = vshrl.u32 %v529_v53, 23  ;;  %v533_v2 = vand.u32 8388607, %v526_v60  ;;  %vm527_vm1 = vcmp.le.f32.partialorder %v526_v60, 0.7853982 }
 0x3b8   :  { %v821_v55 = vadd.s32 4294967169, %v530_v54  ;;  %v534_v21 = vor.u32 8388608, %v533_v2 }
 0x3b9   :  { %v976_v56 = vpop.eup %975 }
 0x3ba   :  { %v486_v57 = vadd.f32 1.0, %v976_v56  ;;  %v536_v58 = vadd.s32 1, %v821_v55  ;;  %v574_v35 = vshll.u32 %v534_v21, 8  ;;  %v496_v55 = vrot.slane %v494_v51, 1 }
 0x3bc   :  { %v487_v59 = vmul.f32 0.5, %v486_v57  ;;  %vm537_vm7 = vcmp.gt.s32.totalorder %v536_v58, 0 }
 0x3bd   :  { %v538_v61 = vsel %vm537_vm7, %v536_v58, 0  ;;  %v498_v58 = vadd.f32 %v496_v55, %v494_v51 }
 0x3be   :  { %v488_v62 = vmul.f32 9.9999, %v487_v59  ;;  %v540_v63 = vand.u32 31, %v538_v61  ;;  %v539_v4 = vshrl.u32 %v538_v61, 5 }
 0x3bf   :  { %977 = vrsqrt.f32 %v498_v58  ;;  %vm501_vm14 = vcmp.eq.f32.partialorder %v498_v58, inf  ;;  %vm503_vm15 = vcmp.eq.f32.partialorder %v498_v58, 0.0 }
 0x3c0   :  { %v489_v1 = vadd.f32 0.0001, %v488_v62  ;;  %v541_v3 = vsub.s32 32, %v540_v63  ;;  %v543_v6 = vshll.u32 %v997_v5, %v540_v63  ;;  %v546_v8 = vshll.u32 %v998_v7, %v540_v63 }
 0x3c1   :  { %v549_v12 = vshll.u32 %v999_v10, %v540_v63  ;;  %v552_v15 = vshll.u32 %v1000_v13, %v540_v63  ;;  %v555_v18 = vshll.u32 %v1001_v16, %v540_v63  ;;  %vm558_vm8 = vcmp.lt.s32.totalorder %v539_v4, 1 }
 0x3c2   :  { %490 = vst [vmem:[%s1200_s4 - $0x2] sm:$0xc] %v489_v1  ;;  %v544_v9 = vshrl.u32 %v998_v7, %v541_v3  ;;  %v547_v11 = vshrl.u32 %v999_v10, %v541_v3  ;;  %v550_v14 = vshrl.u32 %v1000_v13, %v541_v3  ;;  %v553_v17 = vshrl.u32 %v1001_v16, %v541_v3 }
 0x3c3   :  { %v556_v20 = vshrl.u32 %v1002_v19, %v541_v3  ;;  %vm561_vm9 = vcmp.lt.s32.totalorder %v539_v4, 4  ;;  %v542_v30 = vshrl.u32 %v997_v5, %v541_v3  ;;  %vm560_vm10 = vcmp.lt.s32.totalorder %v539_v4, 3 }
 0x3c4   :  { %v545_v22 = vor.u32 %v544_v9, %v543_v6  ;;  %v548_v23 = vor.u32 %v547_v11, %v546_v8  ;;  %v551_v24 = vor.u32 %v550_v14, %v549_v12  ;;  %v554_v25 = vor.u32 %v553_v17, %v552_v15 }
 0x3c5   :  { %v557_v26 = vor.u32 %v556_v20, %v555_v18  ;;  %vm559_vm11 = vcmp.lt.s32.totalorder %v539_v4, 2 }
 0x3c6   :  { %v563_v27 = vsel %vm561_vm9, %v551_v24, 2102212464  ;;  %v566_v28 = vsel %vm558_vm8, %v545_v22, %v548_v23  ;;  %v570_v29 = vsel %vm558_vm8, %v548_v23, %v551_v24  ;;  %v567_v31 = vsel %vm561_vm9, %v554_v25, 920167782 }
 0x3c7   :  { %v571_v32 = vsel %vm561_vm9, %v557_v26, 1326507024  ;;  %v568_v33 = vsel %vm560_vm10, %v551_v24, %v567_v31  ;;  %v562_v36 = vsel %vm558_vm8, %v542_v30, %v545_v22  ;;  %v564_v37 = vsel %vm560_vm10, %v548_v23, %v563_v27 }
 0x3c8   :  { %v572_v34 = vsel %vm560_vm10, %v554_v25, %v571_v32  ;;  %v569_v39 = vsel %vm559_vm11, %v566_v28, %v568_v33  ;;  %v565_v46 = vsel %vm559_vm11, %v562_v36, %v564_v37  ;;  %v504_v22 = vand.u32 2147483648, %v498_v58 }
 0x3c9   :  { %v573_v40 = vsel %vm559_vm11, %v570_v29, %v572_v34  ;;  %v1122_v43 = vmul.u32.u64.low %v574_v35, %v569_v39  ;;  %v1123_v45 = vmul.u32.u64.high %v574_v35, %v569_v39, %v1122_v43  ;;  %v581_v48 = vmul.u32 %v574_v35, %v565_v46  ;;  %v978_v12 = vpop.eup %977 }
 0x3ca   :  { %v1119_v41 = vmul.u32.u64.low %v574_v35, %v573_v40  ;;  %v1120_v42 = vmul.u32.u64.high %v574_v35, %v573_v40, %v1119_v41  ;;  %v500_v15 = vmul.f32 %v978_v12, %v498_v58  ;;  %vm618_vm8 = vweird.f32 %v1099_v52 }
 0x3cb   :  { %v584_v47 = vadd.s32 1, %v1123_v45 }
 0x3cc   :  { %vm583_vm12 = vc.u32 %v1120_v42, %v1122_v43  ;;  %v582_v1 = vadd.s32 %v1122_v43, %v1120_v42  ;;  %v502_v23 = vsel %vm501_vm14, %v498_v58, %v500_v15 }
 0x3cd   :  { %v585_v0 = vsel %vm583_vm12, %v584_v47, %v1123_v45  ;;  %v505_v27 = vsel %vm503_vm15, %v504_v22, %v502_v23 }
 0x3ce   :  { %v586_v49 = vadd.s32 %v585_v0, %v581_v48  ;;  %v630_v30 = vmul.f32 0.05, %v505_v27 }
 0x3d0   :  { %v587_v50 = vadd.s32 536870912, %v586_v49  ;;  %v631_v32 = vadd.f32 0.01, %v630_v30 }
 0x3d2   :  { %v588_v53 = vshrl.u32 %v587_v50, 30  ;;  %v632_v35 = vmul.f32 %v631_v32, %v505_v27 }
 0x3d4   :  { %v589_v54 = vshll.u32 %v588_v53, 30  ;;  %v612_v21 = vsub.s32 4, %v588_v53  ;;  %v634_v41 = vrot.slane %v632_v35, 2 }
 0x3d6   :  { %v590_v56 = vsub.s32 %v586_v49, %v589_v54  ;;  %v613_v26 = vsel %vm528_vm0, %v612_v21, %v588_v53  ;;  %v636_v46 = vsub.f32 %v1092_v44, %v634_v41 }
 0x3d7   :  { %v615_v29 = vsel %vm527_vm1, 0, %v613_v26 }
 0x3d8   :  { %v592_v57 = vsub.s32 0, %v590_v56  ;;  %v619_v31 = vadd.s32 3, %v615_v29  ;;  %v637_v47 = vmul.f32 0.1, %v636_v46 }
 0x3da   :  { %v822_v59 = vmin.u32 %v592_v57, %v590_v56  ;;  %v620_v33 = vand.u32 3, %v619_v31  ;;  %v639_v48 = vrot.slane %v637_v47, 6 }
 0x3dc   :  { %v594_v61 = vclz %v822_v59  ;;  %vm625_vm2 = vcmp.eq.s32.totalorder %v620_v33, 2  ;;  %vm622_vm3 = vcmp.eq.s32.totalorder %v620_v33, 0  ;;  %vm621_vm7 = vcmp.lt.s32.totalorder %v620_v33, 2 }
 0x3dd   :  { %v1140_v49 = vadd.f32 %v639_v48, %v505_v27 }
 0x3de   :  { %v823_v62 = vadd.s32 4294967294, %v594_v61 }
 0x3e0   :  { %vm824_vm13 = vcmp.lt.s32.totalorder %v823_v62, 0 }
 0x3e1   :  { %v597_v63 = vsel %vm824_vm13, 0, %v823_v62 }
 0x3e2   :  { %v598_v2 = vsub.s32 32, %v597_v63  ;;  %v602_v3 = vsub.s32 4294967266, %v597_v63  ;;  %v599_v4 = vshll.u32 %v590_v56, %v597_v63 }
 0x3e4   :  { %v600_v6 = vshrl.u32 %v582_v1, %v598_v2  ;;  %v603_v8 = vadd.s32 127, %v602_v3 }
 0x3e6   :  { %v601_v9 = vor.u32 %v600_v6, %v599_v4  ;;  %v604_v11 = vshll.u32 %v603_v8, 23 }
 0x3e8   :  { %v605_v14 = vor.u32 4788187, %v604_v11  ;;  %v608_v18 = vcvt.s32.f32 %v601_v9 }
 0x3ea   :  { %v606_v17 = vand.u32 2147483647, %v605_v14 }
 0x3ec   :  { %v609_v20 = vmul.f32 %v608_v18, %v606_v17 }
 0x3ee   :  { %v610_v24 = vxor.u32 2147483648, %v609_v20 }
 0x3f0   :  { %v611_v25 = vsel %vm528_vm0, %v610_v24, %v609_v20 }
 0x3f1   :  { %v614_v28 = vsel %vm527_vm1, %v1099_v52, %v611_v25 }
 0x3f2   :  { %979 = vcosq.f32 %v614_v28 }
 0x3f3   :  { %981 = vsinq.f32 %v614_v28 }
 0x3fc   :  { %v980_v34 = vpop.eup %979 }
 0x3fd   :  { %v982_v36 = vpop.eup %981  ;;  %v626_v37 = vxor.u32 2147483648, %v980_v34 }
 0x3fe   :  { %v623_v39 = vxor.u32 2147483648, %v982_v36 }
 0x3ff   :  { %v627_v60 = vsel %vm625_vm2, %v626_v37, %v982_v36 }
 0x400   :  { %v624_v40 = vsel %vm622_vm3, %v980_v34, %v623_v39 }
 0x401   :  { %v628_v42 = vsel %vm621_vm7, %v624_v40, %v627_v60 }
 0x402   :  { %v1136_v43 = vsel %vm618_vm8, nan, %v628_v42 }
 0x403   :  { %v659_v45 = vrot.slane %v1136_v43, 1 }
 0x405   :  { %983 = vrcp.f32 %v659_v45 }
 0x40f   :  { %v984_v0 = vpop.eup %983 }
 0x410   :  { %v662_v50 = vmul.f32 %v984_v0, %v1136_v43 }
 0x412   :  { %v663_v51 = vmul.f32 %v662_v50, %v1140_v49 }
 0x414   :  { %v664_v53 = vmul.f32 0.033783782, %v663_v51 }
 0x416   :  { %v666_v54 = vrot.slane %v664_v53, 6 }
 0x418   :  { %v1145_v52 = vadd.f32 %v666_v54, %v1088_v38 }
 0x41a   :  { %v669_v55 = vadd.f32 1.5707964, %v1145_v52  ;;  %v671_v56 = vrot.slane %v1145_v52, 4 }
 0x41c   :  { %v674_v44 = vrot.slane %v669_v55, 3 }
 0x41e   :  { %v1150_v57 = vsel %vm520_vm4, %v671_v56, %v674_v44 }
 0x41f   :  { %v680_v58 = vand.u32 2139095040, %v1150_v57  ;;  %v677_v63 = vand.u32 2147483647, %v1150_v57  ;;  %vm679_vm0 = vcmp.lt.s32.totalorder %v1150_v57, 0  ;;  %vm769_vm8 = vweird.f32 %v1150_v57 }
 0x421   :  { %v681_v59 = vshrl.u32 %v680_v58, 23  ;;  %v684_v3 = vand.u32 8388607, %v677_v63  ;;  %vm678_vm1 = vcmp.le.f32.partialorder %v677_v63, 0.7853982 }
 0x423   :  { %v825_v61 = vadd.s32 4294967169, %v681_v59  ;;  %v685_v22 = vor.u32 8388608, %v684_v3 }
 0x425   :  { %v687_v62 = vadd.s32 1, %v825_v61 }
 0x427   :  { %vm688_vm9 = vcmp.gt.s32.totalorder %v687_v62, 0 }
 0x428   :  { %v689_v1 = vsel %vm688_vm9, %v687_v62, 0  ;;  %vm794_vm9 = vcmask 1043456  }
 0x429   :  { %v691_v2 = vand.u32 31, %v689_v1  ;;  %v690_v6 = vshrl.u32 %v689_v1, 5 }
 0x42b   :  { %v692_v4 = vsub.s32 32, %v691_v2  ;;  %v694_v8 = vshll.u32 %v997_v5, %v691_v2  ;;  %v697_v9 = vshll.u32 %v998_v7, %v691_v2  ;;  %v700_v14 = vshll.u32 %v999_v10, %v691_v2 }
 0x42c   :  { %v703_v17 = vshll.u32 %v1000_v13, %v691_v2  ;;  %v706_v20 = vshll.u32 %v1001_v16, %v691_v2  ;;  %vm709_vm10 = vcmp.lt.s32.totalorder %v690_v6, 1  ;;  %vm712_vm11 = vcmp.lt.s32.totalorder %v690_v6, 4 }
 0x42d   :  { %v695_v11 = vshrl.u32 %v998_v7, %v692_v4  ;;  %v698_v12 = vshrl.u32 %v999_v10, %v692_v4  ;;  %v701_v15 = vshrl.u32 %v1000_v13, %v692_v4  ;;  %v704_v18 = vshrl.u32 %v1001_v16, %v692_v4 }
 0x42e   :  { %v707_v21 = vshrl.u32 %v1002_v19, %v692_v4  ;;  %v693_v29 = vshrl.u32 %v997_v5, %v692_v4  ;;  %vm711_vm12 = vcmp.lt.s32.totalorder %v690_v6, 3  ;;  %vm710_vm13 = vcmp.lt.s32.totalorder %v690_v6, 2 }
 0x42f   :  { %v696_v23 = vor.u32 %v695_v11, %v694_v8  ;;  %v699_v24 = vor.u32 %v698_v12, %v697_v9  ;;  %v702_v25 = vor.u32 %v701_v15, %v700_v14  ;;  %v705_v26 = vor.u32 %v704_v18, %v703_v17 }
 0x430   :  { %v708_v7 = vor.u32 %v707_v21, %v706_v20  ;;  %v725_v19 = vshll.u32 %v685_v22, 8  ;;  %v643_v17 = vrot.slane %v1136_v43, 7  ;;  %v651_v18 = vrot.slane %v1136_v43, 6 }
 0x431   :  { %v714_v27 = vsel %vm712_vm11, %v702_v25, 2102212464  ;;  %v717_v10 = vsel %vm709_vm10, %v696_v23, %v699_v24  ;;  %v721_v28 = vsel %vm709_vm10, %v699_v24, %v702_v25  ;;  %v718_v13 = vsel %vm712_vm11, %v705_v26, 920167782 }
 0x432   :  { %v722_v30 = vsel %vm712_vm11, %v708_v7, 1326507024  ;;  %v719_v16 = vsel %vm711_vm12, %v702_v25, %v718_v13  ;;  %v713_v32 = vsel %vm709_vm10, %v693_v29, %v696_v23  ;;  %v715_v33 = vsel %vm711_vm12, %v699_v24, %v714_v27 }
 0x433   :  { %v723_v31 = vsel %vm711_vm12, %v705_v26, %v722_v30  ;;  %v720_v34 = vsel %vm710_vm13, %v717_v10, %v719_v16  ;;  %v716_v40 = vsel %vm710_vm13, %v713_v32, %v715_v33  ;;  %v645_v21 = vmul.f32 %v643_v17, %v1140_v49 }
 0x434   :  { %v724_v35 = vsel %vm710_vm13, %v721_v28, %v723_v31  ;;  %v1170_v39 = vmul.u32.u64.low %v725_v19, %v720_v34  ;;  %v1171_v60 = vmul.u32.u64.high %v725_v19, %v720_v34, %v1170_v39  ;;  %v732_v41 = vmul.u32 %v725_v19, %v716_v40 }
 0x435   :  { %v1167_v36 = vmul.u32.u64.low %v725_v19, %v724_v35  ;;  %v1168_v37 = vmul.u32.u64.high %v725_v19, %v724_v35, %v1167_v36  ;;  %v653_v22 = vmul.f32 %v651_v18, %v1140_v49  ;;  %v646_v24 = vmul.f32 0.1, %v645_v21 }
 0x436   :  { %v735_v5 = vadd.s32 1, %v1171_v60 }
 0x437   :  { %vm734_vm14 = vc.u32 %v1168_v37, %v1170_v39  ;;  %v733_v56 = vadd.s32 %v1170_v39, %v1168_v37  ;;  %v654_v25 = vmul.f32 0.1, %v653_v22  ;;  %v648_v10 = vrot.slane %v646_v24, 2 }
 0x438   :  { %v736_v42 = vsel %vm734_vm14, %v735_v5, %v1171_v60 }
 0x439   :  { %v737_v45 = vadd.s32 %v736_v42, %v732_v41  ;;  %v656_v28 = vrot.slane %v654_v25, 1  ;;  %v650_v16 = vadd.f32 %v648_v10, %v1088_v38 }
 0x43b   :  { %v738_v46 = vadd.s32 536870912, %v737_v45  ;;  %v658_v31 = vadd.f32 %v656_v28, %v1088_v38 }
 0x43d   :  { %v739_v47 = vshrl.u32 %v738_v46, 30  ;;  %v791_v36 = vsel %vm520_vm4, %v650_v16, %v658_v31 }
 0x43f   :  { %v740_v48 = vshll.u32 %v739_v47, 30  ;;  %v763_v9 = vsub.s32 4, %v739_v47 }
 0x441   :  { %v741_v0 = vsub.s32 %v737_v45, %v740_v48  ;;  %v764_v14 = vsel %vm679_vm0, %v763_v9, %v739_v47 }
 0x442   :  { %v766_v20 = vsel %vm678_vm1, 0, %v764_v14 }
 0x443   :  { %v743_v50 = vsub.s32 0, %v741_v0  ;;  %v770_v23 = vadd.s32 3, %v766_v20 }
 0x445   :  { %v826_v51 = vmin.u32 %v743_v50, %v741_v0  ;;  %v771_v26 = vand.u32 3, %v770_v23 }
 0x447   :  { %v745_v53 = vclz %v826_v51  ;;  %vm776_vm2 = vcmp.eq.s32.totalorder %v771_v26, 2  ;;  %vm773_vm3 = vcmp.eq.s32.totalorder %v771_v26, 0  ;;  %vm772_vm7 = vcmp.lt.s32.totalorder %v771_v26, 2 }
 0x449   :  { %v827_v54 = vadd.s32 4294967294, %v745_v53 }
 0x44b   :  { %vm828_vm15 = vcmp.lt.s32.totalorder %v827_v54, 0 }
 0x44c   :  { %v748_v55 = vsel %vm828_vm15, 0, %v827_v54 }
 0x44d   :  { %v749_v44 = vsub.s32 32, %v748_v55  ;;  %v753_v58 = vsub.s32 4294967266, %v748_v55  ;;  %v750_v59 = vshll.u32 %v741_v0, %v748_v55 }
 0x44f   :  { %v751_v61 = vshrl.u32 %v733_v56, %v749_v44  ;;  %v754_v62 = vadd.s32 127, %v753_v58 }
 0x451   :  { %v752_v1 = vor.u32 %v751_v61, %v750_v59  ;;  %v755_v2 = vshll.u32 %v754_v62, 23 }
 0x453   :  { %v756_v3 = vor.u32 4788187, %v755_v2  ;;  %v759_v6 = vcvt.s32.f32 %v752_v1 }
 0x455   :  { %v757_v4 = vand.u32 2147483647, %v756_v3 }
 0x457   :  { %v760_v8 = vmul.f32 %v759_v6, %v757_v4 }
 0x459   :  { %v761_v11 = vxor.u32 2147483648, %v760_v8 }
 0x45b   :  { %v762_v12 = vsel %vm679_vm0, %v761_v11, %v760_v8 }
 0x45c   :  { %v765_v15 = vsel %vm678_vm1, %v1150_v57, %v762_v12 }
 0x45d   :  { %985 = vcosq.f32 %v765_v15 }
 0x45e   :  { %987 = vsinq.f32 %v765_v15 }
 0x467   :  { %v986_v63 = vpop.eup %985 }
 0x468   :  { %v988_v7 = vpop.eup %987  ;;  %v777_v27 = vxor.u32 2147483648, %v986_v63 }
 0x469   :  { %v774_v29 = vxor.u32 2147483648, %v988_v7 }
 0x46a   :  { %v778_v43 = vsel %vm776_vm2, %v777_v27, %v988_v7 }
 0x46b   :  { %v775_v13 = vsel %vm773_vm3, %v986_v63, %v774_v29 }
 0x46c   :  { %v779_v30 = vsel %vm772_vm7, %v775_v13, %v778_v43 }
 0x46d   :  { %v780_v19 = vsel %vm769_vm8, nan, %v779_v30 }
 0x46e   :  { %v782_v32 = vrot.slane %v780_v19, 7  ;;  %v785_v33 = vrot.slane %v780_v19, 6 }
 0x470   :  { %v784_v34 = vmul.f32 %v782_v32, %v1140_v49  ;;  %v787_v35 = vmul.f32 %v785_v33, %v1140_v49 }
 0x472   :  { %v789_v37 = vrot.slane %v787_v35, 7  ;;  %v792_v39 = vsel %vm522_vm5, %v791_v36, %v784_v34 }
 0x474   :  { %v793_v57 = vsel %vm524_vm6, %v792_v39, %v789_v37 }
 0x475   :  { %v795_v60 = vsel %vm794_vm9, %v793_v57, %v1145_v52 }
 0x476   :  { %v796_v40 = vmul.f32 0.1, %v795_v60 }
 0x478   :  { %797 = vst [vmem:[%s1201_s3] sm:$0x1f] %v796_v40 }

</bundles_post_ra>
